<compile_context>
chip_gen: v7x
topology: tpu7x:2x2x1
jax: 0.10.0
libtpu: 0.0.40
codegen_flags: <defaults>
</compile_context>

<pallas_src>
import functools
import math

import jax
import jax.numpy as jnp
from jax import lax
from jax.experimental import pallas as pl
from jax.experimental.pallas import tpu as pltpu


def _gelu_exact(x):
    # PyTorch nn.GELU default is the exact (erf-based) GELU.
    return 0.5 * x * (1.0 + lax.erf(x * (1.0 / math.sqrt(2.0))))


def feature_pool_kernel(x_ref, wd_ref, bd_ref, wu_ref, bu_ref, o_ref, acc_ref,
                        *, inv_hw, hw, t_hw, ragged):
    # x_ref:  (tb, c, t_hw)  wd_ref: (c, hidden)   bd_ref: (1, hidden)
    # wu_ref: (hidden, c)    bu_ref: (1, c)        o_ref:  (tb, c)
    # acc_ref: VMEM scratch (tb, c) f32 -- running spatial sum.
    k = pl.program_id(1)
    last = pl.num_programs(1) - 1

    @pl.when(k == 0)
    def _():
        acc_ref[...] = jnp.zeros_like(acc_ref)

    # Accumulate the spatial sum in f32 without materializing an f32 copy of
    # the whole tile.  (If the lane-reduce + (tb, c) relayout ever shows up as
    # exposed on v7x, switch to a (c, tb)-oriented scratch or a ones-vector
    # matvec on the otherwise-idle MXU -- do NOT transpose x in the wrapper.)
    if ragged:
        @pl.when(k < last)
        def _():
            acc_ref[...] += jnp.sum(x_ref[...], axis=-1, dtype=jnp.float32)

        @pl.when(k == last)
        def _():
            # Mask the garbage lanes past hw in the final (partial) tile.
            rem = hw - k * t_hw
            lane = lax.broadcasted_iota(jnp.int32, x_ref.shape, dimension=2)
            x = x_ref[...]
            x = jnp.where(lane < rem, x, jnp.zeros_like(x))
            acc_ref[...] += jnp.sum(x, axis=-1, dtype=jnp.float32)
    else:
        acc_ref[...] += jnp.sum(x_ref[...], axis=-1, dtype=jnp.float32)

    @pl.when(k == last)
    def _():
        pooled = acc_ref[...] * inv_hw                           # (tb, c) f32

        # down: Linear(c -> hidden); native-dtype operands, f32 accumulate.
        h = jnp.dot(pooled.astype(wd_ref.dtype), wd_ref[...],
                    preferred_element_type=jnp.float32)
        h = h + bd_ref[...].astype(jnp.float32)
        h = _gelu_exact(h)                                       # exact GELU

        # up: Linear(hidden -> c)
        y = jnp.dot(h.astype(wu_ref.dtype), wu_ref[...],
                    preferred_element_type=jnp.float32)
        y = y + bu_ref[...].astype(jnp.float32)

        o_ref[...] = y.astype(o_ref.dtype)


def _round_down(x, m):
    return (x // m) * m


def _vmem_capacity_bytes():
    try:
        info = pltpu.get_tpu_info()
        cap = int(getattr(info, "vmem_capacity_bytes", 0))
        if cap > 0:
            return cap
    except Exception:
        pass
    return 64 << 20   # conservative fallback: v7x per-TC capacity


def feature_pool(x, w_down, b_down, w_up, b_up, *, block_budget_bytes=None):
    """x: (b, c, h, w) NCHW.  Returns (b, c) = up(gelu(down(mean_{h,w}(x))))."""
    b, c, h, w = x.shape
    hw = h * w
    hidden = w_down.shape[0]
    itemsize = jnp.dtype(x.dtype).itemsize
    w_itemsize = jnp.dtype(w_down.dtype).itemsize

    wd_t = w_down.T                     # (c, hidden)
    wu_t = w_up.T                       # (hidden, c)
    bd = b_down.reshape(1, hidden)
    bu = b_up.reshape(1, c)

    # ---- VMEM accounting (generation aware) --------------------------------
    vmem_cap = _vmem_capacity_bytes()
    w_total = int(wd_t.size + bd.size + wu_t.size + bu.size) * w_itemsize
    single_buffer_weights = w_total >= (2 << 20)   # only worth it when big
    w_bufs = 1 if single_buffer_weights else 2
    small_fixed = 2 * b * c * itemsize + b * c * 4   # out double-buf + acc

    if block_budget_bytes is not None:
        x_block_budget = int(block_budget_bytes)
    else:
        # v5e/v6e have 128 MiB VMEM -> bigger streaming blocks; v7x has 64 MiB.
        gen_budget = (20 << 20) if vmem_cap >= (96 << 20) else (14 << 20)
        avail = int(0.75 * vmem_cap) - w_bufs * w_total - small_fixed - (4 << 20)
        x_block_budget = max(1 << 20, min(gen_budget, avail // 2))

    # ---- batch tile (multiple of 8 for output sublanes, or full batch) -----
    if b % 8 == 0 and b >= 16:
        tb = max(8, _round_down(b // 2, 8))   # >= 2 "parallel" blocks (v7x 2 TCs)
    elif b > 8:
        tb = max(8, _round_down(pl.cdiv(b, 2), 8))   # ragged last batch block is ok
    else:
        tb = b
    # TODO(synk): for tiny b (nb == 1) on v7x, a core-parallel split of the
    # spatial axis with partial-sum outputs would engage the second TensorCore.
    min_lane = min(128, hw)
    if tb > 8 and tb * c * min_lane * itemsize > x_block_budget:
        # Don't let the 128-lane floor silently blow the budget: shrink tb.
        tb = min(tb, max(8, _round_down(
            x_block_budget // max(1, c * min_lane * itemsize), 8)))
    nb = pl.cdiv(b, tb)

    # ---- spatial tile -------------------------------------------------------
    per_elem = tb * c * itemsize
    if hw <= 128 or hw * per_elem <= x_block_budget:
        t_hw = hw                                # single tile, no masking
    else:
        t_hw = _round_down(x_block_budget // per_elem, 128)
        t_hw = max(128, min(t_hw, pl.cdiv(hw, 128) * 128))
    n_hw = pl.cdiv(hw, t_hw)
    ragged = (hw % t_hw) != 0

    x_flat = x.reshape(b, c, hw)

    # ---- vmem limit from the real footprint ---------------------------------
    x_block_bytes = tb * c * t_hw * itemsize
    needed = (2 * x_block_bytes + w_bufs * w_total
              + 2 * tb * c * itemsize + tb * c * 4)
    vmem_limit = max(needed + (4 << 20), 32 << 20)
    vmem_limit = int(min(vmem_limit, int(0.85 * vmem_cap)))
    vmem_limit = int(max(vmem_limit, needed + (1 << 20)))

    cost = pl.CostEstimate(
        flops=b * c * hw + 4 * b * c * hidden,
        transcendentals=b * hidden,
        bytes_accessed=(x_flat.size * itemsize + w_total + b * c * itemsize),
    )

    kernel = functools.partial(
        feature_pool_kernel, inv_hw=1.0 / float(hw), hw=hw, t_hw=t_hw,
        ragged=ragged)

    def _const_spec(shape):
        # Constant index_map -> VMEM-resident across grid steps.  Single-buffer
        # when the weights are large (default double-buffering would waste a
        # full extra copy of VMEM, fatal for big c on v7x).
        if single_buffer_weights:
            return pl.BlockSpec(shape, lambda i, k: (0, 0),
                                pipeline_mode=pl.Buffered(1))
        return pl.BlockSpec(shape, lambda i, k: (0, 0))

    out = pl.pallas_call(
        kernel,
        out_shape=jax.ShapeDtypeStruct((b, c), x.dtype),
        grid_spec=pltpu.PrefetchScalarGridSpec(
            num_scalar_prefetch=0,
            grid=(nb, n_hw),
            in_specs=[
                # If per-step DMAs ever become small enough that issue latency
                # is exposed, prefer pipeline_mode=pl.Buffered(3) here over
                # shrinking the block.
                pl.BlockSpec((tb, c, t_hw), lambda i, k: (i, 0, k)),
                _const_spec((c, hidden)),
                _const_spec((1, hidden)),
                _const_spec((hidden, c)),
                _const_spec((1, c)),
            ],
            out_specs=pl.BlockSpec((tb, c), lambda i, k: (i, 0)),
            scratch_shapes=[pltpu.VMEM((tb, c), jnp.float32)],
        ),
        compiler_params=pltpu.CompilerParams(
            dimension_semantics=("parallel", "arbitrary"),
            vmem_limit_bytes=vmem_limit),
        cost_estimate=cost,
    )(x_flat, wd_t, bd, wu_t, bu)
    return out


def _reference(x, w_down, b_down, w_up, b_up):
    pooled = jnp.mean(x, axis=(2, 3))                       # (b, c)
    h = pooled @ w_down.T + b_down
    h = _gelu_exact(h)
    return h @ w_up.T + b_up


if __name__ == "__main__":
    key = jax.random.PRNGKey(0)
    kx, kwd, kbd, kwu, kbu, kx2 = jax.random.split(key, 6)

    # Small shapes consistent with the module: dim divisible by ratio=16.
    B, C, H, W = 2, 64, 16, 16
    RATIO = 16
    HID = C // RATIO

    x = jax.random.normal(kx, (B, C, H, W), dtype=jnp.float32)
    # nn.Linear(dim, dim//ratio): weight (HID, C), bias (HID,)
    w_down = jax.random.normal(kwd, (HID, C), dtype=jnp.float32) * 0.1
    b_down = jax.random.normal(kbd, (HID,), dtype=jnp.float32) * 0.1
    # nn.Linear(dim//ratio, dim): weight (C, HID), bias (C,)
    w_up = jax.random.normal(kwu, (C, HID), dtype=jnp.float32) * 0.1
    b_up = jax.random.normal(kbu, (C,), dtype=jnp.float32) * 0.1

    # 1) Default path (single spatial tile).
    y = jax.block_until_ready(feature_pool(x, w_down, b_down, w_up, b_up))
    y_ref = _reference(x, w_down, b_down, w_up, b_up)
    assert y.shape == (B, C), y.shape
    assert jnp.allclose(y, y_ref, atol=1e-5, rtol=1e-5), float(
        jnp.max(jnp.abs(y - y_ref)))

    # 2) Ragged spatial tail + multi-step streaming path: hw = 143 with a tiny
    #    forced block budget exercises the t_hw=128 tiling and in-kernel mask.
    H2, W2 = 13, 11
    x2 = jax.random.normal(kx2, (B, C, H2, W2), dtype=jnp.float32)
    y2 = jax.block_until_ready(
        feature_pool(x2, w_down, b_down, w_up, b_up,
                     block_budget_bytes=64 * 1024))
    y2_ref = _reference(x2, w_down, b_down, w_up, b_up)
    assert jnp.allclose(y2, y2_ref, atol=1e-5, rtol=1e-5), float(
        jnp.max(jnp.abs(y2 - y2_ref)))

    print("KERNEL_OK")
</pallas_src>

<mosaic_0001>
module attributes {stable_mosaic.version = 11 : i64} {
  func.func @feature_pool_kernel(%arg0: i32, %arg1: i32, %arg2: memref<2x64x256xf32, #tpu.memory_space<vmem>>, %arg3: memref<64x4xf32, #tpu.memory_space<vmem>>, %arg4: memref<1x4xf32, #tpu.memory_space<vmem>>, %arg5: memref<4x64xf32, #tpu.memory_space<vmem>>, %arg6: memref<1x64xf32, #tpu.memory_space<vmem>>, %arg7: memref<2x64xf32, #tpu.memory_space<vmem>>, %arg8: memref<2x64xf32, #tpu.memory_space<vmem>>) attributes {dimension_semantics = [#tpu.dimension_semantics<parallel>, #tpu.dimension_semantics<arbitrary>], iteration_bounds = array<i64: 1, 1>, scalar_prefetch = 0 : i64, scratch_operands = 1 : i64, tpu.core_type = #tpu.core_type<tc>, window_params = [{transform_indices = @transform_0, window_bounds = array<i64: 2, 64, 256>}, {pipeline_mode = #tpu.pipeline_mode<synchronous>, transform_indices = @transform_1, window_bounds = array<i64: 64, 4>}, {pipeline_mode = #tpu.pipeline_mode<synchronous>, transform_indices = @transform_2, window_bounds = array<i64: 1, 4>}, {pipeline_mode = #tpu.pipeline_mode<synchronous>, transform_indices = @transform_3, window_bounds = array<i64: 4, 64>}, {pipeline_mode = #tpu.pipeline_mode<synchronous>, transform_indices = @transform_4, window_bounds = array<i64: 1, 64>}, {transform_indices = @transform_5, window_bounds = array<i64: 2, 64>}]} {
    %c0_i32 = arith.constant 0 : i32
    %0 = arith.cmpi eq, %arg1, %c0_i32 : i32
    %1 = arith.extui %0 : i1 to i32
    %c0_i32_0 = arith.constant 0 : i32
    %2 = arith.cmpi ne, %1, %c0_i32_0 : i32
    scf.if %2 {
      %cst_9 = arith.constant 0.000000e+00 : f32
      %11 = vector.broadcast %cst_9 : f32 to vector<2x64xf32>
      %c0_10 = arith.constant 0 : index
      %c0_11 = arith.constant 0 : index
      %12 = vector.load %arg8[%c0_10, %c0_11] : memref<2x64xf32, #tpu.memory_space<vmem>>, vector<2x64xf32>
      tpu.vector_store %arg8[%c0_10, %c0_11], %11 {strides = array<i32>} : memref<2x64xf32, #tpu.memory_space<vmem>>, vector<2x64xf32>,
    } else {
    }
    %c0 = arith.constant 0 : index
    %c0_1 = arith.constant 0 : index
    %3 = vector.load %arg8[%c0, %c0_1] : memref<2x64xf32, #tpu.memory_space<vmem>>, vector<2x64xf32>
    %c0_2 = arith.constant 0 : index
    %c0_3 = arith.constant 0 : index
    %c0_4 = arith.constant 0 : index
    %4 = vector.load %arg2[%c0_2, %c0_3, %c0_4] : memref<2x64x256xf32, #tpu.memory_space<vmem>>, vector<2x64x256xf32>
    %cst = arith.constant dense<0.000000e+00> : vector<2x64xf32>
    %5 = vector.multi_reduction <add>, %4, %cst [2] : vector<2x64x256xf32> to vector<2x64xf32>
    %6 = arith.addf %3, %5 : vector<2x64xf32>
    %c0_5 = arith.constant 0 : index
    %c0_6 = arith.constant 0 : index
    %7 = vector.load %arg8[%c0_5, %c0_6] : memref<2x64xf32, #tpu.memory_space<vmem>>, vector<2x64xf32>
    tpu.vector_store %arg8[%c0_5, %c0_6], %6 {strides = array<i32>} : memref<2x64xf32, #tpu.memory_space<vmem>>, vector<2x64xf32>,
    %c0_i32_7 = arith.constant 0 : i32
    %8 = arith.cmpi eq, %arg1, %c0_i32_7 : i32
    %9 = arith.extui %8 : i1 to i32
    %c0_i32_8 = arith.constant 0 : i32
    %10 = arith.cmpi ne, %9, %c0_i32_8 : i32
    scf.if %10 {
      %c0_9 = arith.constant 0 : index
      %c0_10 = arith.constant 0 : index
      %11 = vector.load %arg8[%c0_9, %c0_10] : memref<2x64xf32, #tpu.memory_space<vmem>>, vector<2x64xf32>
      %cst_11 = arith.constant 3.906250e-03 : f32
      %12 = vector.broadcast %cst_11 : f32 to vector<2x64xf32>
      %13 = arith.mulf %11, %12 : vector<2x64xf32>
      %c0_12 = arith.constant 0 : index
      %c0_13 = arith.constant 0 : index
      %14 = vector.load %arg3[%c0_12, %c0_13] : memref<64x4xf32, #tpu.memory_space<vmem>>, vector<64x4xf32>
      %cst_14 = arith.constant dense<0.000000e+00> : vector<2x4xf32>
      %15 = tpu.matmul %13, %14, %cst_14 {dimension_numbers = #tpu.dot_dimension_numbers<[1], [0], [0], [1], [0, 0, 1, 1], [], []>} : vector<2x64xf32>, vector<64x4xf32>, vector<2x4xf32> -> vector<2x4xf32>
      %c0_15 = arith.constant 0 : index
      %c0_16 = arith.constant 0 : index
      %16 = vector.load %arg4[%c0_15, %c0_16] : memref<1x4xf32, #tpu.memory_space<vmem>>, vector<1x4xf32>
      %17 = vector.broadcast %16 : vector<1x4xf32> to vector<2x4xf32>
      %18 = arith.addf %15, %17 : vector<2x4xf32>
      %cst_17 = arith.constant 5.000000e-01 : f32
      %19 = vector.broadcast %cst_17 : f32 to vector<2x4xf32>
      %20 = arith.mulf %19, %18 : vector<2x4xf32>
      %cst_18 = arith.constant 0.707106769 : f32
      %21 = vector.broadcast %cst_18 : f32 to vector<2x4xf32>
      %22 = arith.mulf %18, %21 : vector<2x4xf32>
      %23 = math.erf %22 : vector<2x4xf32>
      %cst_19 = arith.constant 1.000000e+00 : f32
      %24 = vector.broadcast %cst_19 : f32 to vector<2x4xf32>
      %25 = arith.addf %24, %23 : vector<2x4xf32>
      %26 = arith.mulf %20, %25 : vector<2x4xf32>
      %c0_20 = arith.constant 0 : index
      %c0_21 = arith.constant 0 : index
      %27 = vector.load %arg5[%c0_20, %c0_21] : memref<4x64xf32, #tpu.memory_space<vmem>>, vector<4x64xf32>
      %cst_22 = arith.constant dense<0.000000e+00> : vector<2x64xf32>
      %28 = tpu.matmul %26, %27, %cst_22 {dimension_numbers = #tpu.dot_dimension_numbers<[1], [0], [0], [1], [0, 0, 1, 1], [], []>} : vector<2x4xf32>, vector<4x64xf32>, vector<2x64xf32> -> vector<2x64xf32>
      %c0_23 = arith.constant 0 : index
      %c0_24 = arith.constant 0 : index
      %29 = vector.load %arg6[%c0_23, %c0_24] : memref<1x64xf32, #tpu.memory_space<vmem>>, vector<1x64xf32>
      %30 = vector.broadcast %29 : vector<1x64xf32> to vector<2x64xf32>
      %31 = arith.addf %28, %30 : vector<2x64xf32>
      %c0_25 = arith.constant 0 : index
      %c0_26 = arith.constant 0 : index
      %32 = vector.load %arg7[%c0_25, %c0_26] : memref<2x64xf32, #tpu.memory_space<vmem>>, vector<2x64xf32>
      tpu.vector_store %arg7[%c0_25, %c0_26], %31 {strides = array<i32>} : memref<2x64xf32, #tpu.memory_space<vmem>>, vector<2x64xf32>,
    } else {
    }
    return
  }
  func.func @transform_0(%arg0: i32, %arg1: i32) -> (i32, i32, i32) {
    %c0_i32 = arith.constant 0 : i32
    %c0_i32_0 = arith.constant 0 : i32
    return %arg0, %c0_i32, %arg1 : i32, i32, i32
  }
  func.func @transform_1(%arg0: i32, %arg1: i32) -> (i32, i32) {
    %c0_i32 = arith.constant 0 : i32
    %c0_i32_0 = arith.constant 0 : i32
    %c0_i32_1 = arith.constant 0 : i32
    return %c0_i32, %c0_i32_0 : i32, i32
  }
  func.func @transform_2(%arg0: i32, %arg1: i32) -> (i32, i32) {
    %c0_i32 = arith.constant 0 : i32
    %c0_i32_0 = arith.constant 0 : i32
    %c0_i32_1 = arith.constant 0 : i32
    return %c0_i32, %c0_i32_0 : i32, i32
  }
  func.func @transform_3(%arg0: i32, %arg1: i32) -> (i32, i32) {
    %c0_i32 = arith.constant 0 : i32
    %c0_i32_0 = arith.constant 0 : i32
    %c0_i32_1 = arith.constant 0 : i32
    return %c0_i32, %c0_i32_0 : i32, i32
  }
  func.func @transform_4(%arg0: i32, %arg1: i32) -> (i32, i32) {
    %c0_i32 = arith.constant 0 : i32
    %c0_i32_0 = arith.constant 0 : i32
    %c0_i32_1 = arith.constant 0 : i32
    return %c0_i32, %c0_i32_0 : i32, i32
  }
  func.func @transform_5(%arg0: i32, %arg1: i32) -> (i32, i32) {
    %c0_i32 = arith.constant 0 : i32
    %c0_i32_0 = arith.constant 0 : i32
    return %arg0, %c0_i32 : i32, i32
  }
}

</mosaic_0001>

<bundles_post_ra>
// kernel: tpu_custom_call.1
= control target key start
LH: loop header
LB: loop body
LE: loop exit
PB: predicated region body
PF: predicated region fallthrough
CT: control target
= control target key end

     0   :  { %10 = vsyncpa [#allocation4], 0  ;;  %s655_s0 = inlined_call_operand.hbm [shape: f32[2,64,256], index: 0, kind: input, shape index: {}]   ;;  %s656_s1 = inlined_call_operand.vmem [shape: f32[64,4], index: 1, kind: input, shape index: {}]   ;;  %s657_s2 = inlined_call_operand.vmem [shape: f32[1,4], index: 2, kind: input, shape index: {}]   ;;  %s658_s3 = inlined_call_operand.vmem [shape: f32[4,64], index: 3, kind: input, shape index: {}]   ;;  %s659_s4 = inlined_call_operand.vmem [shape: f32[1,64], index: 4, kind: input, shape index: {}]   ;;  %s660_s5 = inlined_call_operand.hbm [shape: f32[2,64], index: 5, kind: output, shape index: {}]  }
   0x1   :  { %11 = vsyncpa [#allocation5], 0  ;;  %s548_s18 = smov [#allocation3]   ;;  %s500_s22 = scalar_lea.hbm %s655_s0, 4096 }
   0x2   :  { %s17_s19 = sshll.u32 %s548_s18, 4  ;;  %p501_p0 = scmp.ne.s32.totalorder %s655_s0, %s500_s22  ;;  %s18_s19 = int_to_ptr.vmem [resolvable:$true] %s17_s19 }
   0x3   :  { %p504_p1 = scmp.lt.u32.totalorder %s500_s22, %s655_s0 }
   0x5   :  { %p506_p2 = pnand %p504_p1, %p501_p0 }
   0x7   :  { %509 = shalt.err (!%p506_p2)
}
   0x8   :  { %s510_s27 = scalar_lea.vmem %s18_s19, 4096  ;;  %p515_p4 = scmp.lt.s32.totalorder %s18_s19, %s18_s19 }
   0x9   :  { %p511_p3 = scmp.ne.s32.totalorder %s18_s19, %s510_s27  ;;  %p516_p5 = scmp.lt.s32.totalorder %s510_s27, %s510_s27 }
   0xb   :  { %p517_p6 = por %p516_p5, %p515_p4 }
   0xd   :  { %p518_p7 = pnand %p517_p6, %p511_p3 }
   0xf   :  { %521 = shalt.err (!%p518_p7)
}
  0x10   :  { %s549_s28 = smov 256   ;;  %s550_s29 = smov 16  }
  0x11   :  { %23 = dma.hbm_to_vmem [thread:$0]  %s655_s0, 4096, %s18_s19, [#allocation4], %s549_s28, %s549_s28, %s550_s29  }
  0x12   :  { %544 = dma.done.wait [#allocation4], 4096  }
  0x13   :  { %545 = vsyncadd [#allocation4], 4294963200  ;;  %v58_v0 = vld [vmem:[#allocation3 + $0x80] sm:$0xff]  ;;  %v59_v1 = vld [vmem:[#allocation3 + $0x88] sm:$0xff]  ;;  %vm39_vm0 = vcmask 517120   ;;  %v551_v48 = vmov 0.0  }
  0x14   :  { %v42_v2 = vld [vmem:[#allocation3] sm:$0xff]  ;;  %v98_v3 = vadd.f32 %v59_v1, %v58_v0  ;;  %v43_v4 = vld [vmem:[#allocation3 + $0x8] sm:$0xff]  ;;  %v60_v5 = vld [vmem:[#allocation3 + $0x90] sm:$0xff]  ;;  %40 = vst.msk [vmem:[#allocation2] sm:$0x3] %vm39_vm0, %v551_v48  ;;  %474 = vmatprep.subr.mxu1 %v551_v48  ;;  %v552_v52 = vmov 0.0|0.0  }
  0x15   :  { %v61_v6 = vld [vmem:[#allocation3 + $0x98] sm:$0xff]  ;;  %v74_v7 = vadd.f32 %v43_v4, %v42_v2  ;;  %v44_v8 = vld [vmem:[#allocation3 + $0x10] sm:$0xff]  ;;  %v62_v12 = vld [vmem:[#allocation3 + $0xa0] sm:$0xff]  ;;  %479 = vmatprep.subr.bf16.mxu0 %v552_v52  ;;  %vm553_vm1 = vmmov 0   ;;  %v138_v2 = vlaneseq  ;;  %vm149_vm2 = vcmask 130112  }
  0x16   :  { %v45_v9 = vld [vmem:[#allocation3 + $0x18] sm:$0xff]  ;;  %99 = vadd.xlane.f32.xlu1 %v98_v3  ;;  %v101_v10 = vadd.f32 %v61_v6, %v60_v5  ;;  %v63_v13 = vld [vmem:[#allocation3 + $0xa8] sm:$0xff]  ;;  %v46_v14 = vld [vmem:[#allocation3 + $0x20] sm:$0xff]  ;;  %471 = vmatprep.mubr.msk.f32.mxu0 %vm553_vm1, %v551_v48  ;;  %vm156_vm3 = vcmask 195712   ;;  %vm163_vm4 = vcmask 261312   ;;  %vm170_vm5 = vcmask 326912  }
  0x17   :  { %75 = vadd.xlane.f32.xlu0 %v74_v7  ;;  %v77_v11 = vadd.f32 %v45_v9, %v44_v8  ;;  %v47_v15 = vld [vmem:[#allocation3 + $0x28] sm:$0xff]  ;;  %v104_v16 = vadd.f32 %v63_v13, %v62_v12  ;;  %v64_v18 = vld [vmem:[#allocation3 + $0xb0] sm:$0xff]  ;;  %v65_v19 = vld [vmem:[#allocation3 + $0xb8] sm:$0xff]  ;;  %476 = vmatprep.mubr.msk.f32.mxu1 %vm553_vm1, %v551_v48  ;;  %v139_v5 = vand.u32 127, %v138_v2  ;;  %vm177_vm6 = vcmask 392512  }
  0x18   :  { %v80_v17 = vadd.f32 %v47_v15, %v46_v14  ;;  %v48_v20 = vld [vmem:[#allocation3 + $0x30] sm:$0xff]  ;;  %v49_v21 = vld [vmem:[#allocation3 + $0x38] sm:$0xff]  ;;  %v107_v22 = vadd.f32 %v65_v19, %v64_v18  ;;  %v66_v24 = vld [vmem:[#allocation3 + $0xc0] sm:$0xff]  ;;  %vm184_vm7 = vcmask 458112   ;;  %vm191_vm8 = vcmask 523712  }
  0x19   :  { %v83_v23 = vadd.f32 %v49_v21, %v48_v20  ;;  %v67_v25 = vld [vmem:[#allocation3 + $0xc8] sm:$0xff]  ;;  %v50_v26 = vld [vmem:[#allocation3 + $0x40] sm:$0xff]  ;;  %v68_v30 = vld [vmem:[#allocation3 + $0xd0] sm:$0xff]  ;;  %v144_v7 = vadd.s32 4294967288, %v139_v5  ;;  %v151_v9 = vadd.s32 4294967280, %v139_v5  ;;  %v165_v12 = vadd.s32 4294967264, %v139_v5 }
  0x1a   :  { %102 = vadd.xlane.f32.xlu1 %v101_v10  ;;  %v51_v27 = vld [vmem:[#allocation3 + $0x48] sm:$0xff]  ;;  %v110_v28 = vadd.f32 %v67_v25, %v66_v24  ;;  %v69_v31 = vld [vmem:[#allocation3 + $0xd8] sm:$0xff]  ;;  %v52_v32 = vld [vmem:[#allocation3 + $0x50] sm:$0xff]  ;;  %v141_v10 = vshrl.u32 %v138_v2, 7  ;;  %v179_v18 = vadd.s32 4294967248, %v139_v5  ;;  %vm232_vm9 = vcmask 1041409  }
  0x1b   :  { %78 = vadd.xlane.f32.xlu0 %v77_v11  ;;  %v86_v29 = vadd.f32 %v51_v27, %v50_v26  ;;  %v53_v33 = vld [vmem:[#allocation3 + $0x58] sm:$0xff]  ;;  %v113_v34 = vadd.f32 %v69_v31, %v68_v30  ;;  %v70_v36 = vld [vmem:[#allocation3 + $0xe0] sm:$0xff]  ;;  %v71_v37 = vld [vmem:[#allocation3 + $0xe8] sm:$0xff]  ;;  %v158_v11 = vadd.s32 4294967272, %v139_v5  ;;  %v186_v26 = vadd.s32 4294967240, %v139_v5 }
  0x1c   :  { %v89_v35 = vadd.f32 %v53_v33, %v52_v32  ;;  %v54_v38 = vld [vmem:[#allocation3 + $0x60] sm:$0xff]  ;;  %v55_v39 = vld [vmem:[#allocation3 + $0x68] sm:$0xff]  ;;  %v116_v40 = vadd.f32 %v71_v37, %v70_v36  ;;  %v72_v42 = vld [vmem:[#allocation3 + $0xf0] sm:$0xff]  ;;  %v147_v14 = vsub.s32 %v144_v7, %v141_v10  ;;  %v142_v19 = vsub.s32 %v139_v5, %v141_v10 }
  0x1d   :  { %v92_v41 = vadd.f32 %v55_v39, %v54_v38  ;;  %v73_v43 = vld [vmem:[#allocation3 + $0xf8] sm:$0xff]  ;;  %v56_v44 = vld [vmem:[#allocation3 + $0x70] sm:$0xff]  ;;  %v244_v50 = vld [vmem:[%s656_s1 + $0x8] sm:$0xff]  ;;  %v161_v20 = vsub.s32 %v158_v11, %v141_v10  ;;  %v168_v21 = vsub.s32 %v165_v12, %v141_v10  ;;  %vm258_vm10 = vcmask 523264  }
  0x1e   :  { %105 = vadd.xlane.f32.xlu1 %v104_v16  ;;  %v57_v45 = vld [vmem:[#allocation3 + $0x78] sm:$0xff]  ;;  %v119_v46 = vadd.f32 %v73_v43, %v72_v42  ;;  %v245_v53 = vld [vmem:[%s656_s1 + $0x10] sm:$0xff]  ;;  %v248_v57 = vld [vmem:[%s656_s1 + $0x28] sm:$0xff]  ;;  %v172_v16 = vadd.s32 4294967256, %v139_v5  ;;  %vm349_vm11 = vcmask 1043456   ;;  %vm345_vm12 = vcmask 31744  }
  0x1f   :  { %81 = vadd.xlane.f32.xlu0 %v80_v17  ;;  %v95_v47 = vadd.f32 %v57_v45, %v56_v44  ;;  %v243_v49 = vld [vmem:[%s656_s1] sm:$0xff]  ;;  %v246_v54 = vld [vmem:[%s656_s1 + $0x18] sm:$0xff]  ;;  %v249_v59 = vld [vmem:[%s656_s1 + $0x30] sm:$0xff]  ;;  %v154_v17 = vsub.s32 %v151_v9, %v141_v10 }
  0x20   :  { %v480_v51 = vpack.c.bf16 %v244_v50, %v243_v49  ;;  %v483_v55 = vpack.c.bf16 %v246_v54, %v245_v53  ;;  %v247_v56 = vld [vmem:[%s656_s1 + $0x20] sm:$0xff]  ;;  %v250_v60 = vld [vmem:[%s656_s1 + $0x38] sm:$0xff]  ;;  %v175_v24 = vsub.s32 %v172_v16, %v141_v10 }
  0x21   :  { %v486_v58 = vpack.c.bf16 %v248_v57, %v247_v56  ;;  %v489_v61 = vpack.c.bf16 %v250_v60, %v249_v59 }
  0x22   :  { %108 = vadd.xlane.f32.xlu1 %v107_v22  ;;  %481 = vmatpush3.bf16.msra.mxu0 %v480_v51 }
  0x23   :  { %84 = vadd.xlane.f32.xlu0 %v83_v23  ;;  %482 = vmatprep.subr.bf16.mxu0 %v552_v52 }
  0x26   :  { %111 = vadd.xlane.f32.xlu1 %v110_v28  ;;  %484 = vmatpush3.bf16.msra.mxu0 %v483_v55 }
  0x27   :  { %87 = vadd.xlane.f32.xlu0 %v86_v29  ;;  %485 = vmatprep.subr.bf16.mxu0 %v552_v52  ;;  %v182_v29 = vsub.s32 %v179_v18, %v141_v10 }
  0x2a   :  { %114 = vadd.xlane.f32.xlu1 %v113_v34  ;;  %487 = vmatpush3.bf16.msra.mxu0 %v486_v58 }
  0x2b   :  { %90 = vadd.xlane.f32.xlu0 %v89_v35  ;;  %488 = vmatprep.subr.bf16.mxu0 %v552_v52 }
  0x2e   :  { %117 = vadd.xlane.f32.xlu1 %v116_v40  ;;  %490 = vmatpush3.bf16.msra.mxu0 %v489_v61  ;;  %v41_v61 = vld [vmem:[#allocation2] sm:$0x3] }
  0x2f   :  { %93 = vadd.xlane.f32.xlu0 %v92_v41  ;;  %v189_v41 = vsub.s32 %v186_v26, %v141_v10 }
  0x32   :  { %120 = vadd.xlane.f32.xlu1 %v119_v46 }
  0x33   :  { %96 = vadd.xlane.f32.xlu0 %v95_v47 }
  0xa3   :  { %v100_v62 = vpop.xlane.xlu1 %99 }
  0xa4   :  { %v76_v63 = vpop.xlane.xlu0 %75  ;;  %v196_v30 = vrot.slane %v100_v62, %v142_v19 }
  0xa5   :  { %v143_v33 = vrot.slane %v76_v63, %v142_v19 }
  0xa7   :  { %v103_v0 = vpop.xlane.xlu1 %102 }
  0xa8   :  { %v79_v1 = vpop.xlane.xlu0 %78  ;;  %v200_v23 = vrot.slane %v103_v0, %v147_v14 }
  0xa9   :  { %v148_v27 = vrot.slane %v79_v1, %v147_v14 }
  0xaa   :  { %v201_v37 = vsel %vm149_vm2, %v200_v23, %v196_v30 }
  0xab   :  { %v106_v3 = vpop.xlane.xlu1 %105  ;;  %v150_v42 = vsel %vm149_vm2, %v148_v27, %v143_v33 }
  0xac   :  { %v82_v4 = vpop.xlane.xlu0 %81  ;;  %v205_v28 = vrot.slane %v106_v3, %v154_v17  ;;  %v337_v3 = vld [vmem:[%s658_s3] sm:$0xf]  ;;  %s554_s3 = smov [#allocation6]  }
  0xad   :  { %v155_v31 = vrot.slane %v82_v4, %v154_v17  ;;  %475 = vmatpush3.msk.msra.mxu1 %vm349_vm11, %v337_v3  ;;  %v439_v4 = vld [vmem:[%s657_s2] ss:$0 sm:$0xff]  ;;  %s430_s27 = sshll.u32 %s554_s3, 4  ;;  %s431_s27 = int_to_ptr.vmem [resolvable:$true] %s430_s27 }
  0xae   :  { %v206_v43 = vsel %vm156_vm3, %v205_v28, %v201_v37  ;;  %s522_s2 = scalar_lea.vmem %s431_s27, 32  ;;  %p527_p9 = scmp.lt.s32.totalorder %s431_s27, %s431_s27 }
  0xaf   :  { %v109_v6 = vpop.xlane.xlu1 %108  ;;  %v157_v46 = vsel %vm156_vm3, %v155_v31, %v150_v42  ;;  %p523_p8 = scmp.ne.s32.totalorder %s431_s27, %s522_s2  ;;  %p528_p10 = scmp.lt.s32.totalorder %s522_s2, %s522_s2 }
  0xb0   :  { %v85_v8 = vpop.xlane.xlu0 %84  ;;  %v210_v32 = vrot.slane %v109_v6, %v161_v20 }
  0xb1   :  { %v162_v34 = vrot.slane %v85_v8, %v161_v20  ;;  %p529_p11 = por %p528_p10, %p527_p9 }
  0xb2   :  { %v211_v47 = vsel %vm163_vm4, %v210_v32, %v206_v43 }
  0xb3   :  { %v112_v13 = vpop.xlane.xlu1 %111  ;;  %v164_v49 = vsel %vm163_vm4, %v162_v34, %v157_v46  ;;  %p530_p12 = pnand %p529_p11, %p523_p8 }
  0xb4   :  { %v88_v15 = vpop.xlane.xlu0 %87  ;;  %v215_v35 = vrot.slane %v112_v13, %v168_v21  ;;  %v441_v13 = vld [vmem:[%s659_s4] ss:$0 sm:$0xff] }
  0xb5   :  { %v169_v38 = vrot.slane %v88_v15, %v168_v21 }
  0xb6   :  { %v216_v50 = vsel %vm170_vm5, %v215_v35, %v211_v47 }
  0xb7   :  { %v115_v22 = vpop.xlane.xlu1 %114  ;;  %v171_v52 = vsel %vm170_vm5, %v169_v38, %v164_v49 }
  0xb8   :  { %v91_v25 = vpop.xlane.xlu0 %90  ;;  %v220_v39 = vrot.slane %v115_v22, %v175_v24 }
  0xb9   :  { %v176_v44 = vrot.slane %v91_v25, %v175_v24 }
  0xba   :  { %v221_v53 = vsel %vm177_vm6, %v220_v39, %v216_v50 }
  0xbb   :  { %v118_v36 = vpop.xlane.xlu1 %117  ;;  %v178_v56 = vsel %vm177_vm6, %v176_v44, %v171_v52 }
  0xbc   :  { %v94_v40 = vpop.xlane.xlu0 %93  ;;  %v225_v45 = vrot.slane %v118_v36, %v182_v29 }
  0xbd   :  { %v183_v48 = vrot.slane %v94_v40, %v182_v29 }
  0xbe   :  { %v226_v57 = vsel %vm184_vm7, %v225_v45, %v221_v53 }
  0xbf   :  { %v121_v51 = vpop.xlane.xlu1 %120  ;;  %v185_v59 = vsel %vm184_vm7, %v183_v48, %v178_v56 }
  0xc0   :  { %v230_v54 = vrot.slane %v121_v51, %v189_v41  ;;  %v97_v55 = vpop.xlane.xlu0 %96 }
  0xc1   :  { %v190_v58 = vrot.slane %v97_v55, %v189_v41 }
  0xc2   :  { %v231_v60 = vsel %vm191_vm8, %v230_v54, %v226_v57 }
  0xc3   :  { %v192_v62 = vsel %vm191_vm8, %v190_v58, %v185_v59 }
  0xc4   :  { %v233_v63 = vsel %vm232_vm9, %v231_v60, %v192_v62 }
  0xc5   :  { %v235_v0 = vadd.f32 %v233_v63, %v41_v61 }
  0xc7   :  { %237 = vst.msk [vmem:[#allocation2] sm:$0x3] %vm39_vm0, %v235_v0 }
  0xce   :  { %v241_v1 = vld [vmem:[#allocation2] sm:$0x3] }
  0xcf   :  { %v242_v2 = vmul.f32 0.00390625, %v241_v1 }
  0xd1   :  { %472 = vmatmul.mubr.msk.f32.vlgmr.msra.gmra.mrb[0].mxu0 %vm258_vm10, %v242_v2 }
 0x1a4   :  { %v328_v5 = vpop.f32.mrb[0].mxu0 }
 0x1a5   :  { %v329_v6 = vadd.f32 %v439_v4, %v328_v5  ;;  %v473_v7 = vpop.f32.mrb[1].mxu0 }
 0x1a7   :  { %v333_v8 = vmul.f32 0.70710677, %v329_v6  ;;  %v332_v10 = vmul.f32 0.5, %v329_v6 }
 0x1a9   :  { %498 = verf.f32 %v333_v8 }
 0x1b3   :  { %v499_v9 = vpop.eup %498 }
 0x1b4   :  { %v335_v11 = vadd.f32 1.0, %v499_v9 }
 0x1b6   :  { %v336_v12 = vmul.f32 %v335_v11, %v332_v10 }
 0x1b8   :  { %477 = vmatmul.mubr.msk.f32.vlgmr.msra.gmra.mrb[0].mxu1 %vm345_vm12, %v336_v12 }
 0x28b   :  { %v419_v14 = vpop.f32.mrb[0].mxu1 }
 0x28c   :  { %v420_v15 = vadd.f32 %v441_v13, %v419_v14  ;;  %v478_v16 = vpop.f32.mrb[1].mxu1 }
 0x28e   :  { %423 = vst.msk [vmem:[#allocation6] sm:$0x3] %vm39_vm0, %v420_v15 }
 0x28f   :  { %533 = shalt.err (!%p530_p12)
}
 0x290   :  { %s534_s30 = scalar_lea.hbm %s660_s5, 32 }
 0x291   :  { %p535_p13 = scmp.ne.s32.totalorder %s660_s5, %s534_s30  ;;  %p538_p0 = scmp.lt.u32.totalorder %s534_s30, %s660_s5 }
 0x293   :  { %p540_p1 = pnand %p538_p0, %p535_p13 }
 0x295   :  { %543 = shalt.err (!%p540_p1)
}
 0x296   :  { %433 = dma.vmem_to_hbm [thread:$0]  %s431_s27, 32, %s660_s5, [#allocation5]  }
 0x297   :  { %546 = dma.done.wait [#allocation5], 32  }
 0x298   :  { %547 = vsyncadd [#allocation5], 4294967264 }
 0x299   :  { %437 = vsyncpa [#allocation4], 1 }
 0x29a   :  { %438 = vsyncpa [#allocation5], 1 }

</bundles_post_ra>
